<compile_context>
chip_gen: v7x
topology: tpu7x:2x2x1
jax: 0.10.0
libtpu: 0.0.40
codegen_flags: <defaults>
</compile_context>

<pallas_src>
import jax
import jax.numpy as jnp
from jax.experimental import pallas as pl
from jax.experimental.pallas import tpu as pltpu


def decoder_kernel(x_ref,
                   w1_ref, b1_ref,
                   w2_ref, b2_ref,
                   w3_hbm, b3_ref,
                   w4_hbm, b4_ref,
                   o_ref,
                   w3_vmem, w4_vmem, dma_sem):
    step = pl.program_id(0)

    # Manual weight streaming for the two big layers: start at kernel entry,
    # wait right before each dot -> DMA overlaps early-layer compute.
    w3_cp = pltpu.make_async_copy(w3_hbm, w3_vmem, dma_sem.at[0])
    w4_cp = pltpu.make_async_copy(w4_hbm, w4_vmem, dma_sem.at[1])

    @pl.when(step == 0)           # weights are grid-invariant: fetch once
    def _():
        w3_cp.start()
        w4_cp.start()

    mxu = w1_ref.dtype            # bf16 inputs to the MXU

    # Layer 1: Linear(d/16 -> d/8) + ReLU  (bf16 MXU, f32 accumulate/elementwise)
    h = jnp.dot(x_ref[...].astype(mxu), w1_ref[...],
                preferred_element_type=jnp.float32)
    h = jnp.maximum(h + b1_ref[...], 0.0)

    # Layer 2: Linear(d/8 -> d/4) + ReLU
    h = jnp.dot(h.astype(mxu), w2_ref[...],
                preferred_element_type=jnp.float32)
    h = jnp.maximum(h + b2_ref[...], 0.0)

    # Layer 3: Linear(d/4 -> d/2) + ReLU  (streamed weight)
    @pl.when(step == 0)
    def _():
        w3_cp.wait()
    h = jnp.dot(h.astype(mxu), w3_vmem[...],
                preferred_element_type=jnp.float32)
    h = jnp.maximum(h + b3_ref[...], 0.0)

    # Layer 4: Linear(d/2 -> d), no activation  (streamed weight)
    @pl.when(step == 0)
    def _():
        w4_cp.wait()
    h = jnp.dot(h.astype(mxu), w4_vmem[...],
                preferred_element_type=jnp.float32)
    o_ref[...] = (h + b4_ref[...]).astype(o_ref.dtype)


def prepare_params(params_f32):
    """One-time parameter prep (keep OUT of the per-call hot path):
    bf16 weights for the MXU, f32 (1, out) biases for sublane broadcast."""
    return [(w.astype(jnp.bfloat16), b.reshape(1, -1).astype(jnp.float32))
            for (w, b) in params_f32]


def sparse_ae_decoder(x, prepared_params, *, tile_b=None):
    """x: [B, d_model//16] float32.  prepared_params: from prepare_params()."""
    B, f_in = x.shape
    (w1, b1), (w2, b2), (w3, b3), (w4, b4) = prepared_params
    d_model = w4.shape[1]
    dims = (f_in, w1.shape[1], w2.shape[1], w3.shape[1], d_model)

    # Batch tile: whole batch in one grid step for B <= 256 (weight-DMA bound
    # regime); otherwise 256-row tiles so the f32 (tile_b x d/2)/(tile_b x d)
    # intermediates stay VMEM/vreg friendly.  x/out blocks are f32, so any
    # partial tile must be a multiple of 8 rows.
    if tile_b is None:
        tile_b = B if B <= 256 else 256
    if tile_b != B:
        assert tile_b % 8 == 0, tile_b
    n_tiles = -(-B // tile_b)
    B_pad = n_tiles * tile_b
    if B_pad != B:                       # ragged batch: zero-pad, slice back
        x = jnp.pad(x, ((0, B_pad - B), (0, 0)))

    def resident_spec(shape):
        # Grid-invariant data -> single VMEM buffer (no revolving double buffer).
        return pl.BlockSpec(shape, lambda i: (0, 0),
                            pipeline_mode=pl.Buffered(1))

    # Advisory cost estimate for XLA scheduling around this small call.
    flops = 2 * B_pad * sum(k * n for k, n in zip(dims[:-1], dims[1:]))
    weight_bytes = sum(w.size * w.dtype.itemsize + b.size * b.dtype.itemsize
                       for (w, b) in prepared_params)
    bytes_accessed = int(weight_bytes
                         + x.size * x.dtype.itemsize
                         + B_pad * d_model * 4)

    # Explicit VMEM budget: resident bf16 weights + w3/w4 scratch + padded
    # biases + double-buffered x/out blocks + f32 intermediates, 4x headroom,
    # 8 MiB floor, capped at v7x's 64 MiB physical VMEM.
    resident_w = (w1.size + w2.size + w3.size + w4.size) * 2
    bias_padded = 4 * (8 * 128 * 4 + d_model * 4)
    io = 2 * tile_b * (f_in + d_model) * 4
    interm = tile_b * sum(dims[1:]) * 4
    vmem_limit = int(min(64 * 1024 * 1024,
                         max(8 * 1024 * 1024,
                             4 * (resident_w + bias_padded + io + interm))))

    out = pl.pallas_call(
        decoder_kernel,
        out_shape=jax.ShapeDtypeStruct((B_pad, d_model), x.dtype),
        grid_spec=pltpu.PrefetchScalarGridSpec(
            num_scalar_prefetch=0,
            grid=(n_tiles,),
            in_specs=[
                pl.BlockSpec((tile_b, f_in), lambda i: (i, 0)),     # x tile (f32)
                resident_spec(w1.shape), resident_spec(b1.shape),
                resident_spec(w2.shape), resident_spec(b2.shape),
                pl.BlockSpec(memory_space=pl.ANY),                  # w3 (HBM)
                resident_spec(b3.shape),
                pl.BlockSpec(memory_space=pl.ANY),                  # w4 (HBM)
                resident_spec(b4.shape),
            ],
            out_specs=pl.BlockSpec((tile_b, d_model), lambda i: (i, 0)),
            scratch_shapes=[
                pltpu.VMEM(w3.shape, w3.dtype),      # w3 landing buffer
                pltpu.VMEM(w4.shape, w4.dtype),      # w4 landing buffer
                pltpu.SemaphoreType.DMA((2,)),
            ]),
        # Sequential batch axis: the step-0 weight-DMA guard requires it, and
        # at the small-batch sizes this targets the grid is one step anyway.
        compiler_params=pltpu.CompilerParams(
            dimension_semantics=("arbitrary",),
            vmem_limit_bytes=vmem_limit),
        cost_estimate=pl.CostEstimate(flops=flops, transcendentals=0,
                                      bytes_accessed=bytes_accessed),
    )(x, w1, b1, w2, b2, w3, b3, w4, b4)
    return out[:B]


def init_params(key, d_model):
    """Deterministic init matching nn.Linear shapes (weights stored [in, out])."""
    dims = [d_model // 16, d_model // 8, d_model // 4, d_model // 2, d_model]
    params = []
    for li, (fi, fo) in enumerate(zip(dims[:-1], dims[1:])):
        kw, kb = jax.random.split(jax.random.fold_in(key, li))
        bound = 1.0 / jnp.sqrt(fi)
        w = jax.random.uniform(kw, (fi, fo), jnp.float32, -bound, bound)
        b = jax.random.uniform(kb, (fo,), jnp.float32, -bound, bound)
        params.append((w, b))
    return params


def reference_forward_f32(x, params):
    h = x
    for i, (w, b) in enumerate(params):
        h = h @ w + b
        if i < len(params) - 1:
            h = jnp.maximum(h, 0.0)
    return h


def reference_forward_mixed(x, params):
    """Plain-JAX reference with the same bf16-matmul / f32-accumulate policy."""
    h = x.astype(jnp.bfloat16)
    for i, (w, b) in enumerate(params):
        h = jnp.dot(h, w.astype(jnp.bfloat16),
                    preferred_element_type=jnp.float32) + b
        if i < len(params) - 1:
            h = jnp.maximum(h, 0.0).astype(jnp.bfloat16)
    return h


if __name__ == "__main__":
    d_model = 512          # layer widths: 32 -> 64 -> 128 -> 256 -> 512
    batch = 16             # B=16 -> single grid step (grid=(1,))

    key = jax.random.PRNGKey(0)
    kx, kp = jax.random.split(key)
    x = jax.random.normal(kx, (batch, d_model // 16), jnp.float32)
    params_f32 = init_params(kp, d_model)
    params = prepare_params(params_f32)   # one-time bf16 conversion, off the hot path

    out = jax.block_until_ready(sparse_ae_decoder(x, params))
    assert out.shape == (batch, d_model)
    assert out.dtype == jnp.float32

    # Primary check: same mixed-precision math as the kernel.
    ref_mixed = reference_forward_mixed(x, params_f32)
    assert jnp.allclose(out, ref_mixed, atol=1e-2, rtol=1e-2), \
        float(jnp.max(jnp.abs(out - ref_mixed)))

    # Sanity check against full-f32 math (bf16 weights -> ~1e-2 relative error).
    ref_f32 = reference_forward_f32(x, params_f32)
    assert jnp.allclose(out, ref_f32, atol=1e-1, rtol=1e-1)

    print("KERNEL_OK")
</pallas_src>

<mosaic_0001>
module attributes {stable_mosaic.version = 11 : i64} {
  func.func @decoder_kernel(%arg0: i32, %arg1: memref<16x32xf32, #tpu.memory_space<vmem>>, %arg2: memref<32x64xbf16, #tpu.memory_space<vmem>>, %arg3: memref<1x64xf32, #tpu.memory_space<vmem>>, %arg4: memref<64x128xbf16, #tpu.memory_space<vmem>>, %arg5: memref<1x128xf32, #tpu.memory_space<vmem>>, %arg6: memref<128x256xbf16, #tpu.memory_space<any>>, %arg7: memref<1x256xf32, #tpu.memory_space<vmem>>, %arg8: memref<256x512xbf16, #tpu.memory_space<any>>, %arg9: memref<1x512xf32, #tpu.memory_space<vmem>>, %arg10: memref<16x512xf32, #tpu.memory_space<vmem>>, %arg11: memref<128x256xbf16, #tpu.memory_space<vmem>>, %arg12: memref<256x512xbf16, #tpu.memory_space<vmem>>, %arg13: memref<2x!tpu.dma_semaphore, #tpu.memory_space<semaphore_mem>>) attributes {dimension_semantics = [#tpu.dimension_semantics<arbitrary>], iteration_bounds = array<i64: 1>, scalar_prefetch = 0 : i64, scratch_operands = 3 : i64, tpu.core_type = #tpu.core_type<tc>, window_params = [{transform_indices = @transform_0, window_bounds = array<i64: 16, 32>}, {pipeline_mode = #tpu.pipeline_mode<synchronous>, transform_indices = @transform_1, window_bounds = array<i64: 32, 64>}, {pipeline_mode = #tpu.pipeline_mode<synchronous>, transform_indices = @transform_2, window_bounds = array<i64: 1, 64>}, {pipeline_mode = #tpu.pipeline_mode<synchronous>, transform_indices = @transform_3, window_bounds = array<i64: 64, 128>}, {pipeline_mode = #tpu.pipeline_mode<synchronous>, transform_indices = @transform_4, window_bounds = array<i64: 1, 128>}, {}, {pipeline_mode = #tpu.pipeline_mode<synchronous>, transform_indices = @transform_6, window_bounds = array<i64: 1, 256>}, {}, {pipeline_mode = #tpu.pipeline_mode<synchronous>, transform_indices = @transform_8, window_bounds = array<i64: 1, 512>}, {transform_indices = @transform_9, window_bounds = array<i64: 16, 512>}]} {
    %c0_i32 = arith.constant 0 : i32
    %0 = arith.cmpi eq, %arg0, %c0_i32 : i32
    %1 = arith.extui %0 : i1 to i32
    %c0_i32_0 = arith.constant 0 : i32
    %c1_i32 = arith.constant 1 : i32
    %c0_i32_1 = arith.constant 0 : i32
    %2 = arith.cmpi ne, %1, %c0_i32_1 : i32
    scf.if %2 {
      %41 = tpu.memref_slice %arg13[%c0_i32_0] : memref<2x!tpu.dma_semaphore, #tpu.memory_space<semaphore_mem>> -> memref<1x!tpu.dma_semaphore, #tpu.memory_space<semaphore_mem>>
      %42 = tpu.memref_squeeze %41 : memref<1x!tpu.dma_semaphore, #tpu.memory_space<semaphore_mem>> -> memref<!tpu.dma_semaphore, #tpu.memory_space<semaphore_mem>>
      tpu.enqueue_dma source(%arg6 : memref<128x256xbf16, #tpu.memory_space<any>>) target(%arg11 : memref<128x256xbf16, #tpu.memory_space<vmem>>) target_semaphore(%42 : memref<!tpu.dma_semaphore, #tpu.memory_space<semaphore_mem>>)
      %43 = tpu.memref_slice %arg13[%c1_i32] : memref<2x!tpu.dma_semaphore, #tpu.memory_space<semaphore_mem>> -> memref<1x!tpu.dma_semaphore, #tpu.memory_space<semaphore_mem>>
      %44 = tpu.memref_squeeze %43 : memref<1x!tpu.dma_semaphore, #tpu.memory_space<semaphore_mem>> -> memref<!tpu.dma_semaphore, #tpu.memory_space<semaphore_mem>>
      tpu.enqueue_dma source(%arg8 : memref<256x512xbf16, #tpu.memory_space<any>>) target(%arg12 : memref<256x512xbf16, #tpu.memory_space<vmem>>) target_semaphore(%44 : memref<!tpu.dma_semaphore, #tpu.memory_space<semaphore_mem>>)
    } else {
    }
    %c0 = arith.constant 0 : index
    %c0_2 = arith.constant 0 : index
    %3 = vector.load %arg1[%c0, %c0_2] : memref<16x32xf32, #tpu.memory_space<vmem>>, vector<16x32xf32>
    %4 = arith.truncf %3 : vector<16x32xf32> to vector<16x32xbf16>
    %c0_3 = arith.constant 0 : index
    %c0_4 = arith.constant 0 : index
    %5 = vector.load %arg2[%c0_3, %c0_4] : memref<32x64xbf16, #tpu.memory_space<vmem>>, vector<32x64xbf16>
    %cst = arith.constant dense<0.000000e+00> : vector<16x64xf32>
    %6 = tpu.matmul %4, %5, %cst {dimension_numbers = #tpu.dot_dimension_numbers<[1], [0], [0], [1], [0, 0, 1, 1], [], []>} : vector<16x32xbf16>, vector<32x64xbf16>, vector<16x64xf32> -> vector<16x64xf32>
    %c0_5 = arith.constant 0 : index
    %c0_6 = arith.constant 0 : index
    %7 = vector.load %arg3[%c0_5, %c0_6] : memref<1x64xf32, #tpu.memory_space<vmem>>, vector<1x64xf32>
    %8 = vector.broadcast %7 : vector<1x64xf32> to vector<16x64xf32>
    %9 = arith.addf %6, %8 : vector<16x64xf32>
    %cst_7 = arith.constant 0.000000e+00 : f32
    %10 = vector.broadcast %cst_7 : f32 to vector<16x64xf32>
    %11 = arith.maximumf %9, %10 : vector<16x64xf32>
    %12 = arith.truncf %11 : vector<16x64xf32> to vector<16x64xbf16>
    %c0_8 = arith.constant 0 : index
    %c0_9 = arith.constant 0 : index
    %13 = vector.load %arg4[%c0_8, %c0_9] : memref<64x128xbf16, #tpu.memory_space<vmem>>, vector<64x128xbf16>
    %cst_10 = arith.constant dense<0.000000e+00> : vector<16x128xf32>
    %14 = tpu.matmul %12, %13, %cst_10 {dimension_numbers = #tpu.dot_dimension_numbers<[1], [0], [0], [1], [0, 0, 1, 1], [], []>} : vector<16x64xbf16>, vector<64x128xbf16>, vector<16x128xf32> -> vector<16x128xf32>
    %c0_11 = arith.constant 0 : index
    %c0_12 = arith.constant 0 : index
    %15 = vector.load %arg5[%c0_11, %c0_12] : memref<1x128xf32, #tpu.memory_space<vmem>>, vector<1x128xf32>
    %16 = vector.broadcast %15 : vector<1x128xf32> to vector<16x128xf32>
    %17 = arith.addf %14, %16 : vector<16x128xf32>
    %cst_13 = arith.constant 0.000000e+00 : f32
    %18 = vector.broadcast %cst_13 : f32 to vector<16x128xf32>
    %19 = arith.maximumf %17, %18 : vector<16x128xf32>
    %c0_i32_14 = arith.constant 0 : i32
    %20 = arith.cmpi eq, %arg0, %c0_i32_14 : i32
    %21 = arith.extui %20 : i1 to i32
    %c0_i32_15 = arith.constant 0 : i32
    %c0_i32_16 = arith.constant 0 : i32
    %22 = arith.cmpi ne, %21, %c0_i32_16 : i32
    scf.if %22 {
      %41 = tpu.memref_slice %arg13[%c0_i32_15] : memref<2x!tpu.dma_semaphore, #tpu.memory_space<semaphore_mem>> -> memref<1x!tpu.dma_semaphore, #tpu.memory_space<semaphore_mem>>
      %42 = tpu.memref_squeeze %41 : memref<1x!tpu.dma_semaphore, #tpu.memory_space<semaphore_mem>> -> memref<!tpu.dma_semaphore, #tpu.memory_space<semaphore_mem>>
      tpu.wait_dma2 semaphore(%42 : memref<!tpu.dma_semaphore, #tpu.memory_space<semaphore_mem>>) src(%arg6 : memref<128x256xbf16, #tpu.memory_space<any>>) dst(%arg11 : memref<128x256xbf16, #tpu.memory_space<vmem>>)
    } else {
    }
    %23 = arith.truncf %19 : vector<16x128xf32> to vector<16x128xbf16>
    %c0_17 = arith.constant 0 : index
    %c0_18 = arith.constant 0 : index
    %24 = vector.load %arg11[%c0_17, %c0_18] : memref<128x256xbf16, #tpu.memory_space<vmem>>, vector<128x256xbf16>
    %cst_19 = arith.constant dense<0.000000e+00> : vector<16x256xf32>
    %25 = tpu.matmul %23, %24, %cst_19 {dimension_numbers = #tpu.dot_dimension_numbers<[1], [0], [0], [1], [0, 0, 1, 1], [], []>} : vector<16x128xbf16>, vector<128x256xbf16>, vector<16x256xf32> -> vector<16x256xf32>
    %c0_20 = arith.constant 0 : index
    %c0_21 = arith.constant 0 : index
    %26 = vector.load %arg7[%c0_20, %c0_21] : memref<1x256xf32, #tpu.memory_space<vmem>>, vector<1x256xf32>
    %27 = vector.broadcast %26 : vector<1x256xf32> to vector<16x256xf32>
    %28 = arith.addf %25, %27 : vector<16x256xf32>
    %cst_22 = arith.constant 0.000000e+00 : f32
    %29 = vector.broadcast %cst_22 : f32 to vector<16x256xf32>
    %30 = arith.maximumf %28, %29 : vector<16x256xf32>
    %c0_i32_23 = arith.constant 0 : i32
    %31 = arith.cmpi eq, %arg0, %c0_i32_23 : i32
    %32 = arith.extui %31 : i1 to i32
    %c1_i32_24 = arith.constant 1 : i32
    %c0_i32_25 = arith.constant 0 : i32
    %33 = arith.cmpi ne, %32, %c0_i32_25 : i32
    scf.if %33 {
      %41 = tpu.memref_slice %arg13[%c1_i32_24] : memref<2x!tpu.dma_semaphore, #tpu.memory_space<semaphore_mem>> -> memref<1x!tpu.dma_semaphore, #tpu.memory_space<semaphore_mem>>
      %42 = tpu.memref_squeeze %41 : memref<1x!tpu.dma_semaphore, #tpu.memory_space<semaphore_mem>> -> memref<!tpu.dma_semaphore, #tpu.memory_space<semaphore_mem>>
      tpu.wait_dma2 semaphore(%42 : memref<!tpu.dma_semaphore, #tpu.memory_space<semaphore_mem>>) src(%arg8 : memref<256x512xbf16, #tpu.memory_space<any>>) dst(%arg12 : memref<256x512xbf16, #tpu.memory_space<vmem>>)
    } else {
    }
    %34 = arith.truncf %30 : vector<16x256xf32> to vector<16x256xbf16>
    %c0_26 = arith.constant 0 : index
    %c0_27 = arith.constant 0 : index
    %35 = vector.load %arg12[%c0_26, %c0_27] : memref<256x512xbf16, #tpu.memory_space<vmem>>, vector<256x512xbf16>
    %cst_28 = arith.constant dense<0.000000e+00> : vector<16x512xf32>
    %36 = tpu.matmul %34, %35, %cst_28 {dimension_numbers = #tpu.dot_dimension_numbers<[1], [0], [0], [1], [0, 0, 1, 1], [], []>} : vector<16x256xbf16>, vector<256x512xbf16>, vector<16x512xf32> -> vector<16x512xf32>
    %c0_29 = arith.constant 0 : index
    %c0_30 = arith.constant 0 : index
    %37 = vector.load %arg9[%c0_29, %c0_30] : memref<1x512xf32, #tpu.memory_space<vmem>>, vector<1x512xf32>
    %38 = vector.broadcast %37 : vector<1x512xf32> to vector<16x512xf32>
    %39 = arith.addf %36, %38 : vector<16x512xf32>
    %c0_31 = arith.constant 0 : index
    %c0_32 = arith.constant 0 : index
    %40 = vector.load %arg10[%c0_31, %c0_32] : memref<16x512xf32, #tpu.memory_space<vmem>>, vector<16x512xf32>
    tpu.vector_store %arg10[%c0_31, %c0_32], %39 {strides = array<i32>} : memref<16x512xf32, #tpu.memory_space<vmem>>, vector<16x512xf32>,
    return
  }
  func.func @transform_0(%arg0: i32) -> (i32, i32) {
    %c0_i32 = arith.constant 0 : i32
    %c0_i32_0 = arith.constant 0 : i32
    return %arg0, %c0_i32 : i32, i32
  }
  func.func @transform_1(%arg0: i32) -> (i32, i32) {
    %c0_i32 = arith.constant 0 : i32
    %c0_i32_0 = arith.constant 0 : i32
    %c0_i32_1 = arith.constant 0 : i32
    return %c0_i32, %c0_i32_0 : i32, i32
  }
  func.func @transform_2(%arg0: i32) -> (i32, i32) {
    %c0_i32 = arith.constant 0 : i32
    %c0_i32_0 = arith.constant 0 : i32
    %c0_i32_1 = arith.constant 0 : i32
    return %c0_i32, %c0_i32_0 : i32, i32
  }
  func.func @transform_3(%arg0: i32) -> (i32, i32) {
    %c0_i32 = arith.constant 0 : i32
    %c0_i32_0 = arith.constant 0 : i32
    %c0_i32_1 = arith.constant 0 : i32
    return %c0_i32, %c0_i32_0 : i32, i32
  }
  func.func @transform_4(%arg0: i32) -> (i32, i32) {
    %c0_i32 = arith.constant 0 : i32
    %c0_i32_0 = arith.constant 0 : i32
    %c0_i32_1 = arith.constant 0 : i32
    return %c0_i32, %c0_i32_0 : i32, i32
  }
  func.func @transform_6(%arg0: i32) -> (i32, i32) {
    %c0_i32 = arith.constant 0 : i32
    %c0_i32_0 = arith.constant 0 : i32
    %c0_i32_1 = arith.constant 0 : i32
    return %c0_i32, %c0_i32_0 : i32, i32
  }
  func.func @transform_8(%arg0: i32) -> (i32, i32) {
    %c0_i32 = arith.constant 0 : i32
    %c0_i32_0 = arith.constant 0 : i32
    %c0_i32_1 = arith.constant 0 : i32
    return %c0_i32, %c0_i32_0 : i32, i32
  }
  func.func @transform_9(%arg0: i32) -> (i32, i32) {
    %c0_i32 = arith.constant 0 : i32
    %c0_i32_0 = arith.constant 0 : i32
    return %arg0, %c0_i32 : i32, i32
  }
}

</mosaic_0001>

<bundles_post_ra>
// kernel: tpu_custom_call.1
= control target key start
LH: loop header
LB: loop body
LE: loop exit
PB: predicated region body
PF: predicated region fallthrough
CT: control target
= control target key end

     0   :  { %14 = vsyncpa [#allocation6], 0  ;;  %s953_s0 = inlined_call_operand.hbm [shape: f32[16,32], index: 0, kind: input, shape index: {}]   ;;  %s954_s1 = inlined_call_operand.hbm [shape: bf16[32,64], index: 1, kind: input, shape index: {}]   ;;  %s955_s2 = inlined_call_operand.vmem [shape: f32[1,64], index: 2, kind: input, shape index: {}]   ;;  %s956_s3 = inlined_call_operand.hbm [shape: bf16[64,128], index: 3, kind: input, shape index: {}]   ;;  %s957_s4 = inlined_call_operand.vmem [shape: f32[1,128], index: 4, kind: input, shape index: {}]   ;;  %s958_s5 = inlined_call_operand.hbm [shape: bf16[128,256], index: 5, kind: input, shape index: {}]   ;;  %s959_s6 = inlined_call_operand.vmem [shape: f32[1,256], index: 6, kind: input, shape index: {}]   ;;  %s960_s7 = inlined_call_operand.hbm [shape: bf16[256,512], index: 7, kind: input, shape index: {}]   ;;  %s961_s8 = inlined_call_operand.vmem [shape: f32[1,512], index: 8, kind: input, shape index: {}]   ;;  %s962_s9 = inlined_call_operand.hbm [shape: f32[16,512], index: 9, kind: output, shape index: {}]  }
   0x1   :  { %15 = vsyncpa [#allocation9], 0 }
   0x2   :  { %16 = vsyncpa [#allocation7], 0  ;;  %s782_s30 = smov [#allocation8]   ;;  %s684_s13 = scalar_lea.hbm %s954_s1, 256 }
   0x3   :  { %s34_s10 = sshll.u32 %s782_s30, 4  ;;  %p685_p0 = scmp.ne.s32.totalorder %s954_s1, %s684_s13  ;;  %s35_s10 = int_to_ptr.vmem [resolvable:$true] %s34_s10 }
   0x4   :  { %p688_p1 = scmp.lt.u32.totalorder %s684_s13, %s954_s1 }
   0x6   :  { %p690_p2 = pnand %p688_p1, %p685_p0 }
   0x8   :  { %693 = shalt.err (!%p690_p2)
}
   0x9   :  { %s694_s18 = scalar_lea.vmem %s35_s10, 256  ;;  %p699_p4 = scmp.lt.s32.totalorder %s35_s10, %s35_s10 }
   0xa   :  { %p695_p3 = scmp.ne.s32.totalorder %s35_s10, %s694_s18  ;;  %p700_p5 = scmp.lt.s32.totalorder %s694_s18, %s694_s18 }
   0xc   :  { %p701_p6 = por %p700_p5, %p699_p4 }
   0xe   :  { %p702_p7 = pnand %p701_p6, %p695_p3 }
  0x10   :  { %705 = shalt.err (!%p702_p7)
}
  0x11   :  { %s783_s19 = smov 64   ;;  %s784_s20 = smov 4  }
  0x12   :  { %40 = dma.hbm_to_vmem [thread:$0]  %s954_s1, 256, %s35_s10, [#allocation9], %s783_s19, %s783_s19, %s784_s20  }
  0x13   :  { %s785_s23 = smov [#allocation5]   ;;  %s706_s27 = scalar_lea.hbm %s953_s0, 256 }
  0x14   :  { %s22_s24 = sshll.u32 %s785_s23, 4  ;;  %p707_p8 = scmp.ne.s32.totalorder %s953_s0, %s706_s27  ;;  %s23_s24 = int_to_ptr.vmem [resolvable:$true] %s22_s24 }
  0x15   :  { %p710_p9 = scmp.lt.u32.totalorder %s706_s27, %s953_s0 }
  0x17   :  { %p712_p10 = pnand %p710_p9, %p707_p8 }
  0x19   :  { %715 = shalt.err (!%p712_p10)
}
  0x1a   :  { %s716_s12 = scalar_lea.vmem %s23_s24, 256  ;;  %p721_p12 = scmp.lt.s32.totalorder %s23_s24, %s23_s24 }
  0x1b   :  { %p717_p11 = scmp.ne.s32.totalorder %s23_s24, %s716_s12  ;;  %p722_p13 = scmp.lt.s32.totalorder %s716_s12, %s716_s12 }
  0x1d   :  { %p723_p0 = por %p722_p13, %p721_p12 }
  0x1f   :  { %p724_p1 = pnand %p723_p0, %p717_p11 }
  0x21   :  { %727 = shalt.err (!%p724_p1)
}
  0x22   :  { %s786_s1 = smov 128   ;;  %s787_s10 = smov 8  }
  0x23   :  { %28 = dma.hbm_to_vmem [thread:$0]  %s953_s0, 256, %s23_s24, [#allocation6], %s786_s1, %s786_s1, %s787_s10  }
  0x24   :  { %s788_s15 = smov [#allocation10]   ;;  %s728_s21 = scalar_lea.hbm %s956_s3, 512 }
  0x25   :  { %s48_s16 = sshll.u32 %s788_s15, 4  ;;  %p729_p2 = scmp.ne.s32.totalorder %s956_s3, %s728_s21  ;;  %s49_s16 = int_to_ptr.vmem [resolvable:$true] %s48_s16 }
  0x26   :  { %p732_p3 = scmp.lt.u32.totalorder %s728_s21, %s956_s3 }
  0x28   :  { %p734_p4 = pnand %p732_p3, %p729_p2 }
  0x2a   :  { %737 = shalt.err (!%p734_p4)
}
  0x2b   :  { %s738_s27 = scalar_lea.vmem %s49_s16, 512  ;;  %p743_p6 = scmp.lt.s32.totalorder %s49_s16, %s49_s16 }
  0x2c   :  { %p739_p5 = scmp.ne.s32.totalorder %s49_s16, %s738_s27  ;;  %p744_p7 = scmp.lt.s32.totalorder %s738_s27, %s738_s27 }
  0x2e   :  { %p745_p8 = por %p744_p7, %p743_p6 }
  0x30   :  { %p746_p9 = pnand %p745_p8, %p739_p5 }
  0x32   :  { %749 = shalt.err (!%p746_p9)
}
  0x33   :  { %54 = dma.hbm_to_vmem [thread:$0]  %s956_s3, 512, %s49_s16, [#allocation9], %s783_s19, %s783_s19, %s784_s20  }
  0x34   :  { %772 = dma.done.wait [#allocation6], 256  }
  0x35   :  { %773 = vsyncadd [#allocation6], 4294967040 }
  0x36   :  { %774 = dma.done.wait [#allocation9], 768  }
  0x37   :  { %775 = vsyncadd [#allocation9], 4294966528 }
  0x38   :  { %s79_s28 = sld [smem:[#allocation0]]   ;;  %s789_s29 = smov [#allocation2]   ;;  %v801_v1 = vmov 0.0   ;;  %vm802_vm0 = vmmov 0   ;;  %vm171_vm1 = vcmask 261120   ;;  %vm258_vm2 = vcmask 523264  }
  0x39   :  { %s87_s30 = sshll.u32 %s789_s29, 4  ;;  %s790_s11 = smov 256   ;;  %633 = vmatprep.subr.bf16.mxu1 %v801_v1  ;;  %637 = vmatprep.mubr.msk.bf16.mxu1 %vm802_vm0, %v801_v1  ;;  %s88_s30 = int_to_ptr.vmem [resolvable:$true] %s87_s30 }
  0x3a   :  { %91 = sst [smem:[#allocation13]] %s790_s11  ;;  %s791_s12 = smov 2  }
  0x3b   :  { %93 = sst [smem:[#allocation13 + $0x1]] %s790_s11  ;;  %s792_s1 = smov 64  }
  0x3c   :  { %95 = sst [smem:[#allocation13 + $0x2]] %s791_s12  ;;  %s793_s13 = smov 128  }
  0x3d   :  { %97 = sst [smem:[#allocation13 + $0x3]] %s792_s1  ;;  %s794_s3 = smov 4  }
  0x3e   :  { %s609_s10 = sshll.u32 %s79_s28, 26  ;;  %99 = sst [smem:[#allocation13 + $0x4]] %s793_s13 }
  0x3f   :  { %s610_s14 = sadd.s32 134217728, %s609_s10  ;;  %101 = sst [smem:[#allocation13 + $0x5]] %s791_s12 }
  0x40   :  { %103 = sst [smem:[#allocation13 + $0x6]] %s793_s13  ;;  %s795_s19 = smov [#allocation4]  }
  0x41   :  { %105 = sst [smem:[#allocation13 + $0x7]] %s792_s1  ;;  %s796_s20 = smov [#allocation12]  }
  0x42   :  { %107 = sst [smem:[#allocation13 + $0x8]] %s794_s3  ;;  %s797_s17 = smov 512  }
  0x43   :  { %109 = dma.general %s958_s5, 2048, %s88_s30, %s795_s19, %s796_s20, [#allocation13], %s610_s14, 0  }
  0x44   :  { %130 = sst [smem:[#allocation15 + $0x2]] %s794_s3  ;;  %s798_s18 = smov [#allocation3]  }
  0x45   :  { %126 = sst [smem:[#allocation15]] %s797_s17  ;;  %s122_s21 = sshll.u32 %s798_s18, 4  ;;  %s123_s21 = int_to_ptr.vmem [resolvable:$true] %s122_s21 }
  0x46   :  { %128 = sst [smem:[#allocation15 + $0x1]] %s797_s17  ;;  %s799_s22 = smov [#allocation4 + $0x1]  }
  0x47   :  { %132 = sst [smem:[#allocation15 + $0x3]] %s792_s1  ;;  %s800_s23 = smov [#allocation14]  }
  0x48   :  { %134 = sst [smem:[#allocation15 + $0x4]] %s793_s13 }
  0x49   :  { %136 = sst [smem:[#allocation15 + $0x5]] %s791_s12 }
  0x4a   :  { %138 = sst [smem:[#allocation15 + $0x6]] %s790_s11 }
  0x4b   :  { %140 = sst [smem:[#allocation15 + $0x7]] %s792_s1 }
  0x4c   :  { %142 = sst [smem:[#allocation15 + $0x8]] %s794_s3 }
  0x4d   :  { %144 = dma.general %s960_s7, 8192, %s123_s21, %s799_s22, %s800_s23, [#allocation15], %s610_s14, 0  }
  0x4e   :  { %v678_v0 = vld [vmem:[#allocation8] sm:$0xff]   ;;  %v679_v2 = vld [vmem:[#allocation8 + $0x8] sm:$0xff]   ;;  %v145_v3 = vld [vmem:[#allocation5] sm:$0xff] }
  0x4f   :  { %634 = vmatpush3.bf16.msra.mxu1 %v678_v0  ;;  %v146_v4 = vld [vmem:[#allocation5 + $0x8] sm:$0xff]  ;;  %v680_v6 = vld [vmem:[#allocation10] sm:$0xff]   ;;  %v682_v8 = vld [vmem:[#allocation10 + $0x10] sm:$0xff]  }
  0x50   :  { %635 = vmatprep.subr.bf16.mxu1 %v801_v1  ;;  %v147_v5 = vpack.c.bf16 %v146_v4, %v145_v3  ;;  %v681_v7 = vld [vmem:[#allocation10 + $0x8] sm:$0xff]   ;;  %v683_v9 = vld [vmem:[#allocation10 + $0x18] sm:$0xff]   ;;  %v613_v10 = vld [vmem:[%s955_s2] ss:$0 sm:$0xff] }
  0x51   :  { %v617_v20 = vld [vmem:[%s957_s4] ss:$0 sm:$0xff] }
  0x53   :  { %636 = vmatpush3.bf16.msra.mxu1 %v679_v2 }
  0x54   :  { %641 = vmatprep.subr.bf16.mxu1 %v801_v1 }
  0x56   :  { %638 = vmatmul.mubr.msk.bf16.vlgmr.msra.gmra.mrb[0].mxu1 %vm171_vm1, %v147_v5 }
  0x57   :  { %642 = vmatpush3.bf16.msra.mxu1 %v680_v6  ;;  %649 = vmatprep.mubr.msk.bf16.mxu1 %vm802_vm0, %v801_v1 }
  0x58   :  { %643 = vmatprep.subr.bf16.mxu1 %v801_v1 }
  0x5b   :  { %644 = vmatpush3.bf16.msra.mxu1 %v681_v7 }
  0x5c   :  { %645 = vmatprep.subr.bf16.mxu1 %v801_v1 }
  0x5f   :  { %646 = vmatpush3.bf16.msra.mxu1 %v682_v8 }
  0x60   :  { %647 = vmatprep.subr.bf16.mxu1 %v801_v1 }
  0x63   :  { %648 = vmatpush3.bf16.msra.mxu1 %v683_v9 }
 0x129   :  { %v209_v11 = vpop.f32.mrb[0].mxu1 }
 0x12a   :  { %v210_v12 = vadd.f32 %v613_v10, %v209_v11  ;;  %v639_v13 = vpop.f32.mrb[1].mxu1 }
 0x12b   :  { %v212_v14 = vpop.f32.mrb[2].mxu1 }
 0x12c   :  { %v213_v15 = vadd.f32 %v613_v10, %v212_v14  ;;  %v640_v16 = vpop.f32.mrb[3].mxu1  ;;  %v216_v17 = vmax.f32 %v210_v12, 0.0 }
 0x12e   :  { %v217_v18 = vmax.f32 %v213_v15, 0.0 }
 0x130   :  { %v218_v19 = vpack.c.bf16 %v217_v18, %v216_v17 }
 0x132   :  { %650 = vmatmul.mubr.msk.bf16.vlgmr.msra.gmra.mrb[4].mxu1 %vm258_vm2, %v218_v19 }
 0x205   :  { %v296_v21 = vpop.f32.mrb[4].mxu1 }
 0x206   :  { %v297_v22 = vadd.f32 %v617_v20, %v296_v21  ;;  %v651_v23 = vpop.f32.mrb[5].mxu1 }
 0x207   :  { %v299_v24 = vpop.f32.mrb[6].mxu1 }
 0x208   :  { %v303_v25 = vmax.f32 %v297_v22, 0.0  ;;  %v300_v26 = vadd.f32 %v617_v20, %v299_v24  ;;  %v652_v27 = vpop.f32.mrb[7].mxu1 }
 0x20a   :  { %v304_v28 = vmax.f32 %v300_v26, 0.0 }
 0x20b   :  { %776 = dma.done.wait [#allocation4], 2048 }
 0x20c   :  { %777 = vsyncadd [#allocation4], 4294965248  ;;  %v803_v29 = vmov 0   ;;  %v314_v30 = vld [vmem:[#allocation2 + $0x8] sm:$0xff]  ;;  %v313_v31 = vld [vmem:[#allocation2] sm:$0xff]  ;;  %v312_v46 = vpack.c.bf16 %v304_v28, %v303_v25  ;;  %v331_v47 = vlaneseq }
 0x20d   :  { %373 = vmatprep.mubr.bf16.mxu0 %v803_v29  ;;  %v316_v32 = vld [vmem:[#allocation2 + $0x18] sm:$0xff]  ;;  %341 = vmatprep.subr.bf16.mxu0 %v314_v30  ;;  %v315_v33 = vld [vmem:[#allocation2 + $0x10] sm:$0xff]  ;;  %v318_v34 = vld [vmem:[#allocation2 + $0x28] sm:$0xff] }
 0x20e   :  { %342 = vmatpush1.bf16.msra.mxu0 %v313_v31  ;;  %v317_v35 = vld [vmem:[#allocation2 + $0x20] sm:$0xff]  ;;  %v320_v36 = vld [vmem:[#allocation2 + $0x38] sm:$0xff]  ;;  %v319_v37 = vld [vmem:[#allocation2 + $0x30] sm:$0xff]  ;;  %v911_v48 = vshrl.u32 %v331_v47, 7 }
 0x20f   :  { %343 = vmatprep.subr.bf16.mxu0 %v316_v32  ;;  %v322_v38 = vld [vmem:[#allocation2 + $0x48] sm:$0xff]  ;;  %v321_v39 = vld [vmem:[#allocation2 + $0x40] sm:$0xff]  ;;  %v324_v40 = vld [vmem:[#allocation2 + $0x58] sm:$0xff] }
 0x210   :  { %v323_v41 = vld [vmem:[#allocation2 + $0x50] sm:$0xff]  ;;  %v326_v42 = vld [vmem:[#allocation2 + $0x68] sm:$0xff]  ;;  %v325_v43 = vld [vmem:[#allocation2 + $0x60] sm:$0xff]  ;;  %v333_v49 = vsub.s32 0, %v911_v48  ;;  %v337_v51 = vsub.s32 1, %v911_v48 }
 0x211   :  { %v328_v44 = vld [vmem:[#allocation2 + $0x78] sm:$0xff]  ;;  %v327_v45 = vld [vmem:[#allocation2 + $0x70] sm:$0xff]  ;;  %v329_v50 = vld [vmem:[%s959_s6] sm:$0x3] }
 0x212   :  { %344 = vmatpush1.bf16.msra.mxu0 %v315_v33  ;;  %v334_v52 = vrot.slane %v329_v50, %v333_v49  ;;  %v338_v53 = vrot.slane %v329_v50, %v337_v51 }
 0x213   :  { %345 = vmatprep.subr.bf16.mxu0 %v318_v34 }
 0x216   :  { %346 = vmatpush1.bf16.msra.mxu0 %v317_v35 }
 0x217   :  { %347 = vmatprep.subr.bf16.mxu0 %v320_v36 }
 0x21a   :  { %348 = vmatpush1.bf16.msra.mxu0 %v319_v37 }
 0x21b   :  { %349 = vmatprep.subr.bf16.mxu0 %v322_v38 }
 0x21e   :  { %350 = vmatpush1.bf16.msra.mxu0 %v321_v39 }
 0x21f   :  { %351 = vmatprep.subr.bf16.mxu0 %v324_v40 }
 0x222   :  { %352 = vmatpush1.bf16.msra.mxu0 %v323_v41 }
 0x223   :  { %353 = vmatprep.subr.bf16.mxu0 %v326_v42 }
 0x226   :  { %354 = vmatpush1.bf16.msra.mxu0 %v325_v43 }
 0x227   :  { %355 = vmatprep.subr.bf16.mxu0 %v328_v44 }
 0x22a   :  { %356 = vmatpush1.bf16.msra.mxu0 %v327_v45 }
 0x22d   :  { %374 = vmatmul.mubr.bf16.vlgmr.msra.gmra.mrb[0].mxu0 %v312_v46 }
 0x300   :  { %v375_v54 = vpop.f32.mrb[0].mxu0 }
 0x301   :  { %v922_v55 = vadd.f32 %v375_v54, %v334_v52  ;;  %v377_v56 = vpop.f32.mrb[1].mxu0 }
 0x302   :  { %v378_v57 = vadd.f32 %v377_v56, %v338_v53  ;;  %v379_v58 = vpop.f32.mrb[2].mxu0 }
 0x303   :  { %v384_v59 = vmax.f32 %v922_v55, 0.0  ;;  %v925_v60 = vadd.f32 %v379_v58, %v334_v52  ;;  %v381_v61 = vpop.f32.mrb[3].mxu0 }
 0x304   :  { %v385_v62 = vmax.f32 %v378_v57, 0.0  ;;  %v382_v63 = vadd.f32 %v381_v61, %v338_v53 }
 0x305   :  { %v386_v0 = vmax.f32 %v925_v60, 0.0 }
 0x306   :  { %v387_v1 = vmax.f32 %v382_v63, 0.0 }
 0x307   :  { %778 = dma.done.wait [#allocation4 + $0x1], 8192 }
 0x308   :  { %779 = vsyncadd [#allocation4 + $0x1], 4294959104  ;;  %v397_v2 = vpack.c.bf16 %v387_v1, %v385_v62  ;;  %v399_v3 = vld [vmem:[#allocation3 + $0x8] sm:$0xff]  ;;  %v401_v4 = vld [vmem:[#allocation3 + $0x18] sm:$0xff]  ;;  %s804_s28 = smov [#allocation11]  }
 0x309   :  { %v398_v5 = vld [vmem:[#allocation3] sm:$0xff]  ;;  %484 = vmatprep.subr.bf16.mxu1 %v399_v3  ;;  %527 = vmatprep.subr.bf16.mxu0 %v401_v4  ;;  %v400_v6 = vld [vmem:[#allocation3 + $0x10] sm:$0xff]  ;;  %v403_v7 = vld [vmem:[#allocation3 + $0x28] sm:$0xff]  ;;  %s583_s29 = sshll.u32 %s804_s28, 4  ;;  %s584_s29 = int_to_ptr.vmem [resolvable:$true] %s583_s29 }
 0x30a   :  { %516 = vmatprep.mubr.bf16.mxu1 %v397_v2  ;;  %559 = vmatprep.mubr.bf16.mxu0 %v397_v2  ;;  %v405_v8 = vld [vmem:[#allocation3 + $0x38] sm:$0xff]  ;;  %v402_v9 = vld [vmem:[#allocation3 + $0x20] sm:$0xff]  ;;  %v404_v10 = vld [vmem:[#allocation3 + $0x30] sm:$0xff]  ;;  %p755_p11 = scmp.lt.s32.totalorder %s584_s29, %s584_s29 }
 0x30b   :  { %485 = vmatpush1.bf16.msra.mxu1 %v398_v5  ;;  %528 = vmatpush1.bf16.msra.mxu0 %v400_v6  ;;  %v407_v11 = vld [vmem:[#allocation3 + $0x48] sm:$0xff]  ;;  %v409_v12 = vld [vmem:[#allocation3 + $0x58] sm:$0xff]  ;;  %v406_v13 = vld [vmem:[#allocation3 + $0x40] sm:$0xff] }
 0x30c   :  { %486 = vmatprep.subr.bf16.mxu1 %v403_v7  ;;  %529 = vmatprep.subr.bf16.mxu0 %v405_v8  ;;  %v408_v14 = vld [vmem:[#allocation3 + $0x50] sm:$0xff]  ;;  %v411_v15 = vld [vmem:[#allocation3 + $0x68] sm:$0xff]  ;;  %v413_v16 = vld [vmem:[#allocation3 + $0x78] sm:$0xff] }
 0x30d   :  { %v410_v17 = vld [vmem:[#allocation3 + $0x60] sm:$0xff]  ;;  %v412_v18 = vld [vmem:[#allocation3 + $0x70] sm:$0xff]  ;;  %v415_v19 = vld [vmem:[#allocation3 + $0x88] sm:$0xff] }
 0x30e   :  { %v417_v20 = vld [vmem:[#allocation3 + $0x98] sm:$0xff]  ;;  %v414_v21 = vld [vmem:[#allocation3 + $0x80] sm:$0xff]  ;;  %v416_v22 = vld [vmem:[#allocation3 + $0x90] sm:$0xff] }
 0x30f   :  { %487 = vmatpush1.bf16.msra.mxu1 %v402_v9  ;;  %530 = vmatpush1.bf16.msra.mxu0 %v404_v10  ;;  %v419_v23 = vld [vmem:[#allocation3 + $0xa8] sm:$0xff]  ;;  %v421_v24 = vld [vmem:[#allocation3 + $0xb8] sm:$0xff]  ;;  %v418_v25 = vld [vmem:[#allocation3 + $0xa0] sm:$0xff]  ;;  %v396_v10 = vpack.c.bf16 %v386_v0, %v384_v59 }
 0x310   :  { %488 = vmatprep.subr.bf16.mxu1 %v407_v11  ;;  %531 = vmatprep.subr.bf16.mxu0 %v409_v12  ;;  %v420_v26 = vld [vmem:[#allocation3 + $0xb0] sm:$0xff]  ;;  %v423_v27 = vld [vmem:[#allocation3 + $0xc8] sm:$0xff]  ;;  %v425_v28 = vld [vmem:[#allocation3 + $0xd8] sm:$0xff]  ;;  %v474_v11 = vsub.s32 2, %v911_v48 }
 0x311   :  { %v422_v29 = vld [vmem:[#allocation3 + $0xc0] sm:$0xff]  ;;  %v424_v30 = vld [vmem:[#allocation3 + $0xd0] sm:$0xff]  ;;  %v427_v31 = vld [vmem:[#allocation3 + $0xe8] sm:$0xff] }
 0x312   :  { %v429_v32 = vld [vmem:[#allocation3 + $0xf8] sm:$0xff]  ;;  %v426_v33 = vld [vmem:[#allocation3 + $0xe0] sm:$0xff]  ;;  %v428_v34 = vld [vmem:[#allocation3 + $0xf0] sm:$0xff] }
 0x313   :  { %489 = vmatpush1.bf16.msra.mxu1 %v406_v13  ;;  %532 = vmatpush1.bf16.msra.mxu0 %v408_v14  ;;  %v431_v35 = vld [vmem:[#allocation3 + $0x108] sm:$0xff]  ;;  %v433_v36 = vld [vmem:[#allocation3 + $0x118] sm:$0xff]  ;;  %v430_v37 = vld [vmem:[#allocation3 + $0x100] sm:$0xff]  ;;  %v478_v13 = vsub.s32 3, %v911_v48 }
 0x314   :  { %490 = vmatprep.subr.bf16.mxu1 %v411_v15  ;;  %533 = vmatprep.subr.bf16.mxu0 %v413_v16  ;;  %v432_v38 = vld [vmem:[#allocation3 + $0x110] sm:$0xff]  ;;  %v435_v39 = vld [vmem:[#allocation3 + $0x128] sm:$0xff]  ;;  %v437_v40 = vld [vmem:[#allocation3 + $0x138] sm:$0xff] }
 0x315   :  { %v434_v41 = vld [vmem:[#allocation3 + $0x120] sm:$0xff]  ;;  %v436_v42 = vld [vmem:[#allocation3 + $0x130] sm:$0xff]  ;;  %v439_v43 = vld [vmem:[#allocation3 + $0x148] sm:$0xff] }
 0x316   :  { %v441_v44 = vld [vmem:[#allocation3 + $0x158] sm:$0xff]  ;;  %v438_v45 = vld [vmem:[#allocation3 + $0x140] sm:$0xff]  ;;  %v440_v46 = vld [vmem:[#allocation3 + $0x150] sm:$0xff] }
 0x317   :  { %491 = vmatpush1.bf16.msra.mxu1 %v410_v17  ;;  %534 = vmatpush1.bf16.msra.mxu0 %v412_v18  ;;  %v443_v47 = vld [vmem:[#allocation3 + $0x168] sm:$0xff]  ;;  %v445_v50 = vld [vmem:[#allocation3 + $0x178] sm:$0xff]  ;;  %v442_v52 = vld [vmem:[#allocation3 + $0x160] sm:$0xff] }
 0x318   :  { %492 = vmatprep.subr.bf16.mxu1 %v415_v19  ;;  %535 = vmatprep.subr.bf16.mxu0 %v417_v20  ;;  %v444_v53 = vld [vmem:[#allocation3 + $0x170] sm:$0xff]  ;;  %v447_v54 = vld [vmem:[#allocation3 + $0x188] sm:$0xff]  ;;  %v449_v56 = vld [vmem:[#allocation3 + $0x198] sm:$0xff] }
 0x319   :  { %v446_v57 = vld [vmem:[#allocation3 + $0x180] sm:$0xff]  ;;  %v448_v58 = vld [vmem:[#allocation3 + $0x190] sm:$0xff]  ;;  %v451_v61 = vld [vmem:[#allocation3 + $0x1a8] sm:$0xff] }
 0x31a   :  { %v453_v62 = vld [vmem:[#allocation3 + $0x1b8] sm:$0xff]  ;;  %v450_v63 = vld [vmem:[#allocation3 + $0x1a0] sm:$0xff]  ;;  %v452_v1 = vld [vmem:[#allocation3 + $0x1b0] sm:$0xff] }
 0x31b   :  { %493 = vmatpush1.bf16.msra.mxu1 %v414_v21  ;;  %536 = vmatpush1.bf16.msra.mxu0 %v416_v22  ;;  %v455_v2 = vld [vmem:[#allocation3 + $0x1c8] sm:$0xff]  ;;  %v457_v3 = vld [vmem:[#allocation3 + $0x1d8] sm:$0xff]  ;;  %v454_v4 = vld [vmem:[#allocation3 + $0x1c0] sm:$0xff] }
 0x31c   :  { %494 = vmatprep.subr.bf16.mxu1 %v419_v23  ;;  %537 = vmatprep.subr.bf16.mxu0 %v421_v24  ;;  %v456_v5 = vld [vmem:[#allocation3 + $0x1d0] sm:$0xff]  ;;  %v459_v6 = vld [vmem:[#allocation3 + $0x1e8] sm:$0xff]  ;;  %v461_v7 = vld [vmem:[#allocation3 + $0x1f8] sm:$0xff] }
 0x31d   :  { %v458_v8 = vld [vmem:[#allocation3 + $0x1e0] sm:$0xff]  ;;  %v460_v9 = vld [vmem:[#allocation3 + $0x1f0] sm:$0xff] }
 0x31e   :  { %v462_v12 = vld [vmem:[%s961_s8] sm:$0xf]  ;;  %s750_s8 = scalar_lea.vmem %s584_s29, 1024 }
 0x31f   :  { %495 = vmatpush1.bf16.msra.mxu1 %v418_v25  ;;  %538 = vmatpush1.bf16.msra.mxu0 %v420_v26  ;;  %v467_v14 = vrot.slane %v462_v12, %v333_v49  ;;  %v475_v15 = vrot.slane %v462_v12, %v474_v11  ;;  %v471_v55 = vrot.slane %v462_v12, %v337_v51  ;;  %p751_p10 = scmp.ne.s32.totalorder %s584_s29, %s750_s8  ;;  %p756_p12 = scmp.lt.s32.totalorder %s750_s8, %s750_s8 }
 0x320   :  { %496 = vmatprep.subr.bf16.mxu1 %v423_v27  ;;  %539 = vmatprep.subr.bf16.mxu0 %v425_v28  ;;  %v479_v59 = vrot.slane %v462_v12, %v478_v13 }
 0x321   :  { %p757_p13 = por %p756_p12, %p755_p11 }
 0x323   :  { %497 = vmatpush1.bf16.msra.mxu1 %v422_v29  ;;  %540 = vmatpush1.bf16.msra.mxu0 %v424_v30  ;;  %p758_p0 = pnand %p757_p13, %p751_p10 }
 0x324   :  { %498 = vmatprep.subr.bf16.mxu1 %v427_v31  ;;  %541 = vmatprep.subr.bf16.mxu0 %v429_v32 }
 0x327   :  { %499 = vmatpush1.bf16.msra.mxu1 %v426_v33  ;;  %542 = vmatpush1.bf16.msra.mxu0 %v428_v34 }
 0x328   :  { %500 = vmatprep.subr.bf16.mxu1 %v431_v35  ;;  %543 = vmatprep.subr.bf16.mxu0 %v433_v36 }
 0x32b   :  { %501 = vmatpush1.bf16.msra.mxu1 %v430_v37  ;;  %544 = vmatpush1.bf16.msra.mxu0 %v432_v38 }
 0x32c   :  { %502 = vmatprep.subr.bf16.mxu1 %v435_v39  ;;  %545 = vmatprep.subr.bf16.mxu0 %v437_v40 }
 0x32f   :  { %503 = vmatpush1.bf16.msra.mxu1 %v434_v41  ;;  %546 = vmatpush1.bf16.msra.mxu0 %v436_v42 }
 0x330   :  { %504 = vmatprep.subr.bf16.mxu1 %v439_v43  ;;  %547 = vmatprep.subr.bf16.mxu0 %v441_v44 }
 0x333   :  { %505 = vmatpush1.bf16.msra.mxu1 %v438_v45  ;;  %548 = vmatpush1.bf16.msra.mxu0 %v440_v46 }
 0x334   :  { %506 = vmatprep.subr.bf16.mxu1 %v443_v47  ;;  %549 = vmatprep.subr.bf16.mxu0 %v445_v50 }
 0x337   :  { %507 = vmatpush1.bf16.msra.mxu1 %v442_v52  ;;  %550 = vmatpush1.bf16.msra.mxu0 %v444_v53 }
 0x338   :  { %508 = vmatprep.subr.bf16.mxu1 %v447_v54  ;;  %551 = vmatprep.subr.bf16.mxu0 %v449_v56 }
 0x33b   :  { %509 = vmatpush1.bf16.msra.mxu1 %v446_v57  ;;  %552 = vmatpush1.bf16.msra.mxu0 %v448_v58 }
 0x33c   :  { %510 = vmatprep.subr.bf16.mxu1 %v451_v61  ;;  %553 = vmatprep.subr.bf16.mxu0 %v453_v62 }
 0x33f   :  { %511 = vmatpush1.bf16.msra.mxu1 %v450_v63  ;;  %554 = vmatpush1.bf16.msra.mxu0 %v452_v1 }
 0x340   :  { %512 = vmatprep.subr.bf16.mxu1 %v455_v2  ;;  %555 = vmatprep.subr.bf16.mxu0 %v457_v3 }
 0x343   :  { %513 = vmatpush1.bf16.msra.mxu1 %v454_v4  ;;  %556 = vmatpush1.bf16.msra.mxu0 %v456_v5 }
 0x344   :  { %514 = vmatprep.subr.bf16.mxu1 %v459_v6  ;;  %557 = vmatprep.subr.bf16.mxu0 %v461_v7 }
 0x347   :  { %515 = vmatpush1.bf16.msra.mxu1 %v458_v8  ;;  %558 = vmatpush1.bf16.msra.mxu0 %v460_v9 }
 0x34a   :  { %517 = vmatmul.mubr.bf16.vlgmr.msra.gmra.mrb[8].mxu1 %v396_v10  ;;  %560 = vmatmul.mubr.bf16.vlgmr.msra.gmra.mrb[4].mxu0 %v396_v10 }
 0x41d   :  { %v518_v60 = vpop.f32.mrb[8].mxu1  ;;  %v561_v0 = vpop.f32.mrb[4].mxu0 }
 0x41e   :  { %v519_v16 = vadd.f32 %v518_v60, %v467_v14  ;;  %v562_v17 = vadd.f32 %v561_v0, %v475_v15  ;;  %v520_v18 = vpop.f32.mrb[9].mxu1  ;;  %v563_v19 = vpop.f32.mrb[5].mxu0 }
 0x41f   :  { %v521_v20 = vadd.f32 %v520_v18, %v471_v55  ;;  %v564_v21 = vadd.f32 %v563_v19, %v479_v59  ;;  %v522_v22 = vpop.f32.mrb[10].mxu1  ;;  %v565_v23 = vpop.f32.mrb[6].mxu0 }
 0x420   :  { %570 = vst [vmem:[#allocation11] sm:$0xff] %v519_v16  ;;  %572 = vst [vmem:[#allocation11 + $0x10] sm:$0xff] %v562_v17  ;;  %v523_v49 = vadd.f32 %v522_v22, %v467_v14  ;;  %v566_v24 = vadd.f32 %v565_v23, %v475_v15  ;;  %v524_v25 = vpop.f32.mrb[11].mxu1  ;;  %v567_v48 = vpop.f32.mrb[7].mxu0 }
 0x421   :  { %571 = vst [vmem:[#allocation11 + $0x8] sm:$0xff] %v521_v20  ;;  %573 = vst [vmem:[#allocation11 + $0x18] sm:$0xff] %v564_v21  ;;  %v525_v51 = vadd.f32 %v524_v25, %v471_v55  ;;  %v568_v26 = vadd.f32 %v567_v48, %v479_v59 }
 0x422   :  { %574 = vst [vmem:[#allocation11 + $0x20] sm:$0xff] %v523_v49  ;;  %576 = vst [vmem:[#allocation11 + $0x30] sm:$0xff] %v566_v24 }
 0x423   :  { %575 = vst [vmem:[#allocation11 + $0x28] sm:$0xff] %v525_v51  ;;  %577 = vst [vmem:[#allocation11 + $0x38] sm:$0xff] %v568_v26 }
 0x424   :  { %761 = shalt.err (!%p758_p0)
}
 0x425   :  { %s762_s12 = scalar_lea.hbm %s962_s9, 1024 }
 0x426   :  { %p763_p1 = scmp.ne.s32.totalorder %s962_s9, %s762_s12  ;;  %p766_p2 = scmp.lt.u32.totalorder %s762_s12, %s962_s9 }
 0x428   :  { %p768_p3 = pnand %p766_p2, %p763_p1 }
 0x42a   :  { %771 = shalt.err (!%p768_p3)
}
 0x42b   :  { %s805_s3 = smov 512   ;;  %s806_s19 = smov 32  }
 0x42c   :  { %589 = dma.vmem_to_hbm [thread:$0]  %s584_s29, 1024, %s962_s9, [#allocation7], %s805_s3, %s805_s3, %s806_s19  }
 0x42d   :  { %780 = dma.done.wait [#allocation7], 1024  }
 0x42e   :  { %781 = vsyncadd [#allocation7], 4294966272 }
 0x42f   :  { %593 = vsyncpa [#allocation6], 1 }
 0x430   :  { %594 = vsyncpa [#allocation9], 1 }
 0x431   :  { %595 = vsyncpa [#allocation7], 1 }
 0x432   :  { %596 = vsyncmov [#allocation4] }
 0x435   :  { %s597_s16 = vpop.sfrf %596 }
 0x436   :  { %p623_p4 = scmp.ne.s32.totalorder %s597_s16, 0 }
 0x438   :  { %601 = shalt.err (%p623_p4)  }
 0x439   :  { %603 = vsyncmov [#allocation4 + $0x1] }
 0x43c   :  { %s604_s17 = vpop.sfrf %603 }
 0x43d   :  { %p624_p5 = scmp.ne.s32.totalorder %s604_s17, 0 }
 0x43f   :  { %608 = shalt.err (%p624_p5)  }

</bundles_post_ra>
